<compile_context>
chip_gen: v7x
topology: tpu7x:2x2x1
jax: 0.10.0
libtpu: 0.0.40
codegen_flags: <defaults>
</compile_context>

<pallas_src>
import functools

import jax
import jax.numpy as jnp
from jax import lax
from jax.experimental import pallas as pl
from jax.experimental.pallas import tpu as pltpu


def _round_up(x, m):
    return (x + m - 1) // m * m


# ---------------------------------------------------------------------------
# Pallas kernel: one lane-dense matmul tile with fused bias epilogue
# ---------------------------------------------------------------------------
def _conv_matmul_kernel(x_ref, w_ref, b_ref, o_ref):
    """x_ref: (Mt, K) bf16, w_ref: (K, LT) bf16, b_ref: (1, LT) f32,
    o_ref: (Mt, LT) f32."""
    o_ref[...] = jnp.dot(x_ref[...], w_ref[...],
                         preferred_element_type=jnp.float32) + b_ref[...]


@functools.partial(jax.jit, static_argnames=("k", "n"))
def _conv_forward(x, wb, b_row, *, k, n):
    """x: (B, C, H, W) f32, wb: (k*W*C, NOW_pad) bf16, b_row: (1, NOW_pad) f32
    -> (B, n, OH, OW) f32 via one lane-dense Pallas matmul."""
    B, C, H, W = x.shape
    OH, OW = H - k + 1, W - k + 1
    K = k * W * C
    NOW = n * OW
    NOW_pad = wb.shape[-1]

    # Single layout pass: NCHW -> (B, H, W*C) bf16 row slabs.
    # TODO(synk): standardizing on NHWC activations upstream would delete this
    # transpose (an extra HBM read+write of x per call).
    x_rows = jnp.transpose(x, (0, 2, 3, 1)).reshape(B, H, W * C)
    x_rows = x_rows.astype(jnp.bfloat16)

    # K-fold patches: lane index = dy*(W*C) + x*C + c — the k row-shifted
    # slabs concatenated along lanes (k slices, not a k*k im2col expansion).
    patches = jnp.concatenate(
        [x_rows[:, dy:dy + OH, :] for dy in range(k)], axis=-1)
    patches = patches.reshape(B * OH, K)

    # Flatten (B, OH) into the matmul M dim and block it so that many images
    # share one grid step (amortizes per-step overhead, large DMAs).
    rows = B * OH
    Mt = min(512, _round_up(rows, 8))
    rows_pad = _round_up(rows, Mt)
    if rows_pad != rows:
        patches = jnp.pad(patches, ((0, rows_pad - rows), (0, 0)))

    LT = 128                       # lane tile: bounds the weight block VMEM
    grid = (rows_pad // Mt, NOW_pad // LT)

    out = pl.pallas_call(
        _conv_matmul_kernel,
        out_shape=jax.ShapeDtypeStruct((rows_pad, NOW_pad), jnp.float32),
        grid_spec=pltpu.PrefetchScalarGridSpec(
            num_scalar_prefetch=0,
            grid=grid,
            in_specs=[
                pl.BlockSpec((Mt, K), lambda i, j: (i, 0)),   # patch rows
                pl.BlockSpec((K, LT), lambda i, j: (0, j)),   # banded weights
                pl.BlockSpec((1, LT), lambda i, j: (0, j)),   # bias row
            ],
            out_specs=pl.BlockSpec((Mt, LT), lambda i, j: (i, j)),
        ),
        compiler_params=pltpu.CompilerParams(
            dimension_semantics=("parallel", "parallel")),
    )(patches, wb, b_row)

    # Drop row / lane padding, then (B*OH, N*OW) -> (B, N, OH, OW).
    out = out[:rows, :NOW].reshape(B, OH, n, OW).transpose(0, 2, 1, 3)
    return out


# ---------------------------------------------------------------------------
# ConvolutionLayer equivalent
# ---------------------------------------------------------------------------
class ConvolutionLayer:
    """JAX/Pallas port of the PyTorch ConvolutionLayer (fully-connected and
    sparse-`connections` variants)."""

    def __init__(self, in_channels, num_filters, filter_size, efficient=False,
                 connections=None, key=jax.random.PRNGKey(42)):
        self.in_channels = in_channels
        self.num_filters = num_filters
        self.filter_size = filter_size
        # TODO(synk): `efficient` only selects a torch implementation strategy
        # (same math), so it is not modeled separately here.
        self.efficient = efficient
        self.connections = connections
        self.fc = not connections

        k = filter_size
        wkey, bkey = jax.random.split(key)
        if self.fc:
            bound = 1.0 / (in_channels * k * k) ** 0.5
            weight = jax.random.uniform(
                wkey, (num_filters, in_channels, k, k),
                minval=-bound, maxval=bound, dtype=jnp.float32)
            bias = jax.random.uniform(
                bkey, (num_filters,), minval=-bound, maxval=bound,
                dtype=jnp.float32)
        else:
            # Each per-filter (len(conn_i), k, k) weight is embedded into the
            # full channel space with zeros on unconnected channels — exactly
            # equivalent to selecting channels before convolving.  Bias bounds
            # use the per-filter fan-in (matches the per-filter sub-module).
            weight = jnp.zeros((num_filters, in_channels, k, k), jnp.float32)
            biases = []
            for i, conn in enumerate(connections):
                bound = 1.0 / (len(conn) * k * k) ** 0.5
                wi = jax.random.uniform(
                    jax.random.fold_in(wkey, i), (len(conn), k, k),
                    minval=-bound, maxval=bound, dtype=jnp.float32)
                weight = weight.at[i, jnp.array(conn)].set(wi)
                biases.append(jax.random.uniform(
                    jax.random.fold_in(bkey, i), (), minval=-bound,
                    maxval=bound, dtype=jnp.float32))
            bias = jnp.stack(biases)

        self.weight = weight          # (N, C, k, k)  OIHW
        self.bias = bias              # (N,)
        self._banded_cache = {}       # per spatial-width banded weights

    def _banded_params(self, W):
        """Banded weight (k*W*C, NOW_pad) bf16 + padded bias row for width W."""
        if W in self._banded_cache:
            return self._banded_cache[W]
        k, C, N = self.filter_size, self.in_channels, self.num_filters
        OW = W - k + 1
        NOW = N * OW
        NOW_pad = _round_up(NOW, 128)      # lane-dense (unmasked) stores

        # w_perm[dy, dx*C + c, n] = weight[n, c, dy, dx]
        w_perm = jnp.transpose(self.weight, (2, 3, 1, 0)).reshape(k, k * C, N)
        # wb4[dy, x*C + c, n, ox] = weight[n, c, dy, x - ox] for 0 <= x-ox < k
        wb4 = jnp.zeros((k, W * C, N, OW), jnp.float32)
        for ox in range(OW):
            wb4 = wb4.at[:, ox * C:(ox + k) * C, :, ox].set(w_perm)
        wb = wb4.reshape(k * W * C, NOW)
        wb = jnp.pad(wb, ((0, 0), (0, NOW_pad - NOW))).astype(jnp.bfloat16)

        b_row = jnp.pad(jnp.repeat(self.bias, OW), (0, NOW_pad - NOW))[None, :]
        b_row = b_row.astype(jnp.float32)                   # (1, NOW_pad)

        self._banded_cache[W] = (wb, b_row)
        return wb, b_row

    def __call__(self, x):
        B, C, H, W = x.shape
        assert C == self.in_channels, \
            "channel number mismatch in forward pass in conv layer"
        wb, b_row = self._banded_params(W)
        out = _conv_forward(x, wb, b_row, k=self.filter_size,
                            n=self.num_filters)            # (B, N, OH, OW)

        # Reproduce torch's `.squeeze()` then batch==1 unsqueeze.  NOTE: like
        # torch's no-axis squeeze, this also drops spatial dims if out_size==1.
        out = jnp.squeeze(out)
        if B == 1:
            out = out[None]
        return out


# ---------------------------------------------------------------------------
if __name__ == "__main__":
    key = jax.random.PRNGKey(0)
    batch, in_channels, in_size = 2, 4, 16
    num_filters, filter_size = 6, 5

    x = jax.random.normal(key, (batch, in_channels, in_size, in_size),
                          jnp.float32)

    layer = ConvolutionLayer(in_channels, num_filters, filter_size,
                             key=jax.random.PRNGKey(1))
    out = jax.block_until_ready(layer(x))

    out_size = in_size - filter_size + 1
    assert out.shape == (batch, num_filters, out_size, out_size), out.shape

    # Reference #1: XLA VALID conv on the same bf16-rounded operands the MXU
    # sees (f32 accumulation on both sides -> only summation-order noise).
    xq = x.astype(jnp.bfloat16).astype(jnp.float32)
    wq = layer.weight.astype(jnp.bfloat16).astype(jnp.float32)
    ref = lax.conv_general_dilated(
        xq, wq, window_strides=(1, 1), padding="VALID",
        dimension_numbers=("NCHW", "OIHW", "NCHW"))
    ref = ref + layer.bias[None, :, None, None]
    assert jnp.allclose(out, ref, atol=1e-3, rtol=1e-3), \
        float(jnp.max(jnp.abs(out - ref)))

    # Reference #2: full-f32 conv, loose tolerance — bounds the bf16 operand
    # rounding instead of masking it.
    ref32 = lax.conv_general_dilated(
        x, layer.weight, window_strides=(1, 1), padding="VALID",
        dimension_numbers=("NCHW", "OIHW", "NCHW"))
    ref32 = ref32 + layer.bias[None, :, None, None]
    assert jnp.allclose(out, ref32, atol=5e-2, rtol=0.0), \
        float(jnp.max(jnp.abs(out - ref32)))

    # batch == 1 path: exercises the M-row padding and the squeeze/unsqueeze
    # contract of the original module.
    out1 = jax.block_until_ready(layer(x[:1]))
    assert out1.shape == (1, num_filters, out_size, out_size), out1.shape
    assert jnp.allclose(out1, ref[:1], atol=1e-3, rtol=1e-3)

    print("KERNEL_OK")
</pallas_src>

<mosaic_0001>
module attributes {stable_mosaic.version = 11 : i64} {
  func.func @_conv_matmul_kernel(%arg0: i32, %arg1: i32, %arg2: memref<24x320xbf16, #tpu.memory_space<vmem>>, %arg3: memref<320x128xbf16, #tpu.memory_space<vmem>>, %arg4: memref<1x128xf32, #tpu.memory_space<vmem>>, %arg5: memref<24x128xf32, #tpu.memory_space<vmem>>) attributes {dimension_semantics = [#tpu.dimension_semantics<parallel>, #tpu.dimension_semantics<parallel>], iteration_bounds = array<i64: 1, 1>, scalar_prefetch = 0 : i64, scratch_operands = 0 : i64, tpu.core_type = #tpu.core_type<tc>, window_params = [{transform_indices = @transform_0, window_bounds = array<i64: 24, 320>}, {transform_indices = @transform_1, window_bounds = array<i64: 320, 128>}, {transform_indices = @transform_2, window_bounds = array<i64: 1, 128>}, {transform_indices = @transform_3, window_bounds = array<i64: 24, 128>}]} {
    %c0 = arith.constant 0 : index
    %c0_0 = arith.constant 0 : index
    %0 = vector.load %arg2[%c0, %c0_0] : memref<24x320xbf16, #tpu.memory_space<vmem>>, vector<24x320xbf16>
    %c0_1 = arith.constant 0 : index
    %c0_2 = arith.constant 0 : index
    %1 = vector.load %arg3[%c0_1, %c0_2] : memref<320x128xbf16, #tpu.memory_space<vmem>>, vector<320x128xbf16>
    %cst = arith.constant dense<0.000000e+00> : vector<24x128xf32>
    %2 = tpu.matmul %0, %1, %cst {dimension_numbers = #tpu.dot_dimension_numbers<[1], [0], [0], [1], [0, 0, 1, 1], [], []>} : vector<24x320xbf16>, vector<320x128xbf16>, vector<24x128xf32> -> vector<24x128xf32>
    %c0_3 = arith.constant 0 : index
    %c0_4 = arith.constant 0 : index
    %3 = vector.load %arg4[%c0_3, %c0_4] : memref<1x128xf32, #tpu.memory_space<vmem>>, vector<1x128xf32>
    %4 = vector.broadcast %3 : vector<1x128xf32> to vector<24x128xf32>
    %5 = arith.addf %2, %4 : vector<24x128xf32>
    %c0_5 = arith.constant 0 : index
    %c0_6 = arith.constant 0 : index
    %6 = vector.load %arg5[%c0_5, %c0_6] : memref<24x128xf32, #tpu.memory_space<vmem>>, vector<24x128xf32>
    tpu.vector_store %arg5[%c0_5, %c0_6], %5 {strides = array<i32>} : memref<24x128xf32, #tpu.memory_space<vmem>>, vector<24x128xf32>,
    return
  }
  func.func @transform_0(%arg0: i32, %arg1: i32) -> (i32, i32) {
    %c0_i32 = arith.constant 0 : i32
    %c0_i32_0 = arith.constant 0 : i32
    return %arg0, %c0_i32 : i32, i32
  }
  func.func @transform_1(%arg0: i32, %arg1: i32) -> (i32, i32) {
    %c0_i32 = arith.constant 0 : i32
    %c0_i32_0 = arith.constant 0 : i32
    return %c0_i32, %arg1 : i32, i32
  }
  func.func @transform_2(%arg0: i32, %arg1: i32) -> (i32, i32) {
    %c0_i32 = arith.constant 0 : i32
    %c0_i32_0 = arith.constant 0 : i32
    return %c0_i32, %arg1 : i32, i32
  }
  func.func @transform_3(%arg0: i32, %arg1: i32) -> (i32, i32) {
    %c0_i32 = arith.constant 0 : i32
    return %arg0, %arg1 : i32, i32
  }
}

</mosaic_0001>

<bundles_post_ra>
// kernel: _conv_forward.1
= control target key start
LH: loop header
LB: loop body
LE: loop exit
PB: predicated region body
PF: predicated region fallthrough
CT: control target
= control target key end

     0   :  { %vm213_vm0 = vcmask 523264   ;;  %s534_s1 = inlined_call_operand.vmem [shape: bf16[320,128], index: 1, kind: input, shape index: {}]   ;;  %s535_s0 = inlined_call_operand.vmem [shape: bf16[24,320], index: 0, kind: input, shape index: {}]   ;;  %s536_s2 = inlined_call_operand.vmem [shape: f32[1,128], index: 2, kind: input, shape index: {}]   ;;  %s537_s3 = inlined_call_operand.vmem [shape: f32[24,128], index: 3, kind: output, shape index: {}]  }
   0x1   :  { %v398_v0 = vld [vmem:[%s534_s1 + $0x40] sm:$0xff]   ;;  %v400_v2 = vld [vmem:[%s534_s1 + $0x48] sm:$0xff]   ;;  %v402_v4 = vld [vmem:[%s534_s1 + $0x50] sm:$0xff]  }
   0x2   :  { %v399_v1 = vld [vmem:[%s534_s1] sm:$0xff]   ;;  %352 = vmatprep.subr.bf16.mxu0 %v398_v0  ;;  %v401_v3 = vld [vmem:[%s534_s1 + $0x8] sm:$0xff]   ;;  %v403_v5 = vld [vmem:[%s534_s1 + $0x10] sm:$0xff]  }
   0x3   :  { %353 = vmatpush3.bf16.msra.mxu0 %v399_v1  ;;  %v404_v6 = vld [vmem:[%s534_s1 + $0x58] sm:$0xff]   ;;  %v409_v8 = vld [vmem:[%s534_s1 + $0x80] sm:$0xff]   ;;  %v412_v10 = vld [vmem:[%s534_s1 + $0x88] sm:$0xff]  }
   0x4   :  { %354 = vmatprep.subr.bf16.mxu0 %v400_v2  ;;  %v405_v7 = vld [vmem:[%s534_s1 + $0x18] sm:$0xff]   ;;  %v406_v9 = vld [vmem:[%s534_s1 + $0x60] sm:$0xff]   ;;  %386 = vmatprep.subr.bf16.mxu1 %v409_v8  ;;  %v408_v12 = vld [vmem:[%s534_s1 + $0x68] sm:$0xff]  }
   0x5   :  { %387 = vmatpush3.bf16.msra.mxu1 %v409_v8  ;;  %v407_v11 = vld [vmem:[%s534_s1 + $0x20] sm:$0xff]   ;;  %v415_v13 = vld [vmem:[%s534_s1 + $0x90] sm:$0xff]   ;;  %v410_v14 = vld [vmem:[%s534_s1 + $0x28] sm:$0xff]  }
   0x6   :  { %388 = vmatprep.subr.bf16.mxu1 %v412_v10  ;;  %v411_v15 = vld [vmem:[%s534_s1 + $0x70] sm:$0xff]   ;;  %v420_v17 = vld [vmem:[%s534_s1 + $0x98] sm:$0xff]   ;;  %v422_v21 = vld [vmem:[%s535_s0 + $0x20] ss:$0 sps:$4 sm:$0xff]  }
   0x7   :  { %355 = vmatpush3.bf16.msra.mxu0 %v401_v3  ;;  %v419_v16 = vld [vmem:[%s535_s0 + $0x4] ss:$12 sps:$4 sm:$0xff]   ;;  %v421_v18 = vld [vmem:[%s535_s0 + $0x8] ss:$12 sps:$4 sm:$0xff]   ;;  %v414_v20 = vld [vmem:[%s534_s1 + $0x78] sm:$0xff]  }
   0x8   :  { %356 = vmatprep.subr.bf16.mxu0 %v402_v4  ;;  %252 = vmatprep.mubr.bf16.mxu0 %v419_v16  ;;  %v413_v19 = vld [vmem:[%s534_s1 + $0x30] sm:$0xff]   ;;  %v416_v22 = vld [vmem:[%s534_s1 + $0x38] sm:$0xff]   ;;  %v417_v24 = vld [vmem:[%s535_s0] ss:$12 sps:$4 sm:$0xff]  }
   0x9   :  { %389 = vmatpush3.bf16.msra.mxu1 %v412_v10  ;;  %394 = vmatprep.mubr.msk.bf16.mxu1 %vm213_vm0, %v421_v18  ;;  %v19_v23 = vld [vmem:[%s535_s0 + $0x18] sm:$0xff]  ;;  %v323_v33 = vld [vmem:[%s536_s2] ss:$0 sm:$0xff] }
   0xa   :  { %390 = vmatprep.subr.bf16.mxu1 %v415_v13  ;;  %v328_v25 = vcombine.high %v19_v23, %v19_v23  ;;  %v327_v26 = vcombine.low %v19_v23, %v19_v23 }
   0xb   :  { %357 = vmatpush3.bf16.msra.mxu0 %v403_v5 }
   0xc   :  { %358 = vmatprep.subr.bf16.mxu0 %v404_v6 }
   0xd   :  { %391 = vmatpush3.bf16.msra.mxu1 %v415_v13 }
   0xe   :  { %392 = vmatprep.subr.bf16.mxu1 %v420_v17 }
   0xf   :  { %359 = vmatpush3.bf16.msra.mxu0 %v405_v7 }
  0x10   :  { %360 = vmatprep.subr.bf16.mxu0 %v406_v9 }
  0x11   :  { %393 = vmatpush3.bf16.msra.mxu1 %v420_v17 }
  0x13   :  { %361 = vmatpush3.bf16.msra.mxu0 %v407_v11 }
  0x14   :  { %362 = vmatprep.subr.bf16.mxu0 %v408_v12  ;;  %395 = vmatmul.mubr.msk.bf16.vlgmr.msra.gmra.mrb[0].mxu1 %vm213_vm0, %v422_v21 }
  0x17   :  { %363 = vmatpush3.bf16.msra.mxu0 %v410_v14 }
  0x18   :  { %364 = vmatprep.subr.bf16.mxu0 %v411_v15 }
  0x1b   :  { %365 = vmatpush3.bf16.msra.mxu0 %v413_v19 }
  0x1c   :  { %366 = vmatprep.subr.bf16.mxu0 %v414_v20 }
  0x1f   :  { %367 = vmatpush3.bf16.msra.mxu0 %v416_v22 }
  0x22   :  { %253 = vmatmul.mubr.bf16.vlgmr.msra.gmra.mrb[0].mxu0 %v417_v24 }
  0x23   :  { %260 = vmatprep.mubr.bf16.mxu0 %v328_v25 }
  0x2a   :  { %261 = vmatmul.mubr.bf16.gmra.mrb[4].mxu0 %v327_v26 }
  0xe7   :  { %v396_v27 = vpop.f32.mrb[0].mxu1 }
  0xe8   :  { %v302_v28 = vpop.f32.mrb[1].mxu1 }
  0xe9   :  { %v397_v29 = vpop.f32.mrb[2].mxu1 }
  0xea   :  { %v305_v30 = vpop.f32.mrb[3].mxu1 }
  0xf5   :  { %v368_v31 = vpop.f32.mrb[0].mxu0 }
  0xf6   :  { %v369_v32 = vpop.f32.mrb[1].mxu0 }
  0xf7   :  { %v370_v34 = vadd.f32 %v369_v32, %v368_v31  ;;  %v371_v35 = vpop.f32.mrb[2].mxu0 }
  0xf8   :  { %v372_v36 = vpop.f32.mrb[3].mxu0 }
  0xf9   :  { %v373_v37 = vadd.f32 %v372_v36, %v371_v35  ;;  %v255_v38 = vadd.f32 %v370_v34, %v323_v33 }
  0xfb   :  { %v303_v39 = vadd.f32 %v302_v28, %v255_v38  ;;  %v258_v40 = vadd.f32 %v373_v37, %v323_v33 }
  0xfd   :  { %316 = vst [vmem:[%s537_s3] sm:$0xff] %v303_v39  ;;  %v306_v41 = vadd.f32 %v305_v30, %v258_v40  ;;  %v374_v42 = vpop.f32.mrb[4].mxu0 }
  0xfe   :  { %v375_v43 = vpop.f32.mrb[5].mxu0 }
  0xff   :  { %317 = vst [vmem:[%s537_s3 + $0x8] sm:$0xff] %v306_v41  ;;  %v376_v44 = vadd.f32 %v375_v43, %v374_v42  ;;  %v377_v45 = vpop.f32.mrb[6].mxu0 }
 0x100   :  { %v378_v46 = vpop.f32.mrb[7].mxu0 }
 0x101   :  { %v263_v47 = vadd.f32 %v376_v44, %v323_v33 }
 0x103   :  { %v311_v48 = vadd.f32 %v396_v27, %v263_v47 }
 0x105   :  { %318 = vst [vmem:[%s537_s3 + $0x10] sm:$0xff] %v311_v48 }

</bundles_post_ra>
